<compile_context>
chip_gen: v7x
topology: tpu7x:2x2x1
jax: 0.10.0
libtpu: 0.0.40
codegen_flags: <defaults>
</compile_context>

<pallas_src>
import jax
import jax.numpy as jnp
from jax import lax
from jax.experimental import pallas as pl
from jax.experimental.pallas import tpu as pltpu


# ----------------------------------------------------------------------------
# Parameter prep: done ONCE at init time (no per-step transpose HLOs).
# ----------------------------------------------------------------------------
def prepare_params(w_i2h, b_i2h, w_h2h, b_h2h, matmul_dtype=jnp.float32):
    """Pre-transpose the two nn.Linear weights and pre-sum the biases.

    Returns:
      wi_t: (input_size, hidden_size)  i2h weight, pre-transposed
      wh_t: (hidden_size, hidden_size) h2h weight, pre-transposed
      b:    (1, hidden_size)           b_i2h + b_h2h (f32)
    matmul_dtype=jnp.bfloat16 cuts MXU passes ~3x (accuracy tradeoff).
    """
    wi_t = jnp.transpose(w_i2h).astype(matmul_dtype)
    wh_t = jnp.transpose(w_h2h).astype(matmul_dtype)
    b = (b_i2h + b_h2h).astype(jnp.float32).reshape(1, -1)
    return wi_t, wh_t, b


# ----------------------------------------------------------------------------
# Single-timestep kernel (the module's forward). Grid-less, no staging scratch.
# ----------------------------------------------------------------------------
def _core_step_kernel(g_ref, h_ref, wi_ref, wh_ref, b_ref, o_ref):
    mm_dt = wi_ref.dtype
    acc = jnp.dot(g_ref[...].astype(mm_dt), wi_ref[...],
                  preferred_element_type=jnp.float32)
    acc = acc + jnp.dot(h_ref[...].astype(mm_dt), wh_ref[...],
                        preferred_element_type=jnp.float32)
    o_ref[...] = jnp.maximum(acc + b_ref[...], 0.0).astype(o_ref.dtype)


def core_network_forward(g_t, h_t_prev, wi_t, wh_t, b):
    """One RNN step. g_t: (B, input_size), h_t_prev: (B, hidden_size)."""
    B, in_size = g_t.shape
    H = wh_t.shape[-1]
    cost = pl.CostEstimate(
        flops=2 * B * (in_size + H) * H,
        transcendentals=0,
        bytes_accessed=4 * (B * in_size + B * H + (in_size + H) * H + H + B * H),
    )
    return pl.pallas_call(
        _core_step_kernel,
        out_shape=jax.ShapeDtypeStruct((B, H), g_t.dtype),
        in_specs=[pl.BlockSpec(memory_space=pltpu.VMEM)] * 5,
        out_specs=pl.BlockSpec(memory_space=pltpu.VMEM),
        cost_estimate=cost,
    )(g_t, h_t_prev, wi_t, wh_t, b)


# ----------------------------------------------------------------------------
# T recurrent timesteps fused into ONE grid-less pallas_call.
# ----------------------------------------------------------------------------
def _core_scan_kernel(g_ref, h0_ref, wi_ref, wh_ref, b_ref, o_ref, ig_ref):
    T, B, in_size = g_ref.shape
    H = wh_ref.shape[-1]
    mm_dt = wi_ref.dtype

    # Batched input projection: one (T*B, in) @ (in, H) MXU pass, bias folded in.
    g_flat = g_ref[...].reshape(T * B, in_size).astype(mm_dt)
    ig = jnp.dot(g_flat, wi_ref[...], preferred_element_type=jnp.float32)
    ig_ref[...] = (ig + b_ref[...]).reshape(T, B, H)

    wh = wh_ref[...]  # resident in vregs/VMEM for the whole loop

    def step(t, h):
        # Serial critical path: only h @ Wh + ig[t], ReLU. h is a vreg carry.
        h_new = jnp.maximum(
            jnp.dot(h.astype(mm_dt), wh, preferred_element_type=jnp.float32)
            + ig_ref[t],
            0.0,
        )
        o_ref[t] = h_new.astype(o_ref.dtype)
        return h_new

    lax.fori_loop(0, T, step, h0_ref[...].astype(jnp.float32), unroll=True)


def core_network_scan(g_seq, h0, wi_t, wh_t, b):
    """Run the RNN cell over a whole sequence inside one kernel invocation.

    g_seq: (T, B, input_size), h0: (B, hidden_size).
    Returns h_seq: (T, B, hidden_size) with h_seq[t] = h_t.
    """
    T, B, in_size = g_seq.shape
    H = wh_t.shape[-1]
    cost = pl.CostEstimate(
        flops=2 * T * B * in_size * H + 2 * T * B * H * H,
        transcendentals=0,
        bytes_accessed=4 * (T * B * in_size + B * H + (in_size + H) * H + H
                            + T * B * H),
    )
    # TODO(synk): for multi-sequence batches on v7x, add a leading 'parallel'
    # grid axis over sequences so both TensorCores run independent recurrences.
    return pl.pallas_call(
        _core_scan_kernel,
        out_shape=jax.ShapeDtypeStruct((T, B, H), g_seq.dtype),
        in_specs=[pl.BlockSpec(memory_space=pltpu.VMEM)] * 5,
        out_specs=pl.BlockSpec(memory_space=pltpu.VMEM),
        scratch_shapes=[pltpu.VMEM((T, B, H), jnp.float32)],  # precomputed ig
        cost_estimate=cost,
    )(g_seq, h0, wi_t, wh_t, b)


if __name__ == "__main__":
    B = 8
    input_size = 32
    hidden_size = 32
    T = 8

    key = jax.random.PRNGKey(0)
    k_g, k_h, k_wi, k_bi, k_wh, k_bh, k_seq = jax.random.split(key, 7)

    g_t = jax.random.normal(k_g, (B, input_size), dtype=jnp.float32)
    h_t_prev = jax.random.normal(k_h, (B, hidden_size), dtype=jnp.float32)
    g_seq = jax.random.normal(k_seq, (T, B, input_size), dtype=jnp.float32)

    # Deterministic parameter init mimicking nn.Linear: U(-1/sqrt(fan_in), +).
    bound_i = 1.0 / jnp.sqrt(jnp.float32(input_size))
    bound_h = 1.0 / jnp.sqrt(jnp.float32(hidden_size))
    w_i2h = jax.random.uniform(k_wi, (hidden_size, input_size),
                               minval=-bound_i, maxval=bound_i, dtype=jnp.float32)
    b_i2h = jax.random.uniform(k_bi, (hidden_size,),
                               minval=-bound_i, maxval=bound_i, dtype=jnp.float32)
    w_h2h = jax.random.uniform(k_wh, (hidden_size, hidden_size),
                               minval=-bound_h, maxval=bound_h, dtype=jnp.float32)
    b_h2h = jax.random.uniform(k_bh, (hidden_size,),
                               minval=-bound_h, maxval=bound_h, dtype=jnp.float32)

    # Parameter prep happens ONCE, not per step.
    wi_t, wh_t, b = prepare_params(w_i2h, b_i2h, w_h2h, b_h2h)
    jax.block_until_ready((wi_t, wh_t, b))

    # --- single timestep (the module's forward), f32 ---
    h_t = core_network_forward(g_t, h_t_prev, wi_t, wh_t, b)
    jax.block_until_ready(h_t)

    ref_step = jnp.maximum(
        g_t @ w_i2h.T + b_i2h + h_t_prev @ w_h2h.T + b_h2h, 0.0)
    assert h_t.shape == (B, hidden_size)
    assert jnp.allclose(h_t, ref_step, atol=1e-4, rtol=1e-4)

    # --- T timesteps fused into one grid-less pallas_call, f32 ---
    h_seq = core_network_scan(g_seq, h_t_prev, wi_t, wh_t, b)
    jax.block_until_ready(h_seq)

    def ref_scan(gs, h0):
        h = h0
        outs = []
        for t in range(T):
            h = jnp.maximum(gs[t] @ w_i2h.T + b_i2h + h @ w_h2h.T + b_h2h, 0.0)
            outs.append(h)
        return jnp.stack(outs)

    ref_seq = ref_scan(g_seq, h_t_prev)
    assert h_seq.shape == (T, B, hidden_size)
    assert jnp.allclose(h_seq, ref_seq, atol=1e-4, rtol=1e-4)

    # --- optional bf16-MXU variant (accuracy tradeoff; loose tolerance) ---
    wi_bf, wh_bf, b_bf = prepare_params(w_i2h, b_i2h, w_h2h, b_h2h,
                                        matmul_dtype=jnp.bfloat16)
    h_seq_bf = core_network_scan(g_seq, h_t_prev, wi_bf, wh_bf, b_bf)
    jax.block_until_ready(h_seq_bf)
    assert jnp.allclose(h_seq_bf, ref_seq, atol=0.25, rtol=0.25)

    print("KERNEL_OK")
</pallas_src>

<mosaic_0001>
module attributes {stable_mosaic.version = 11 : i64} {
  func.func @_core_step_kernel(%arg0: memref<8x32xf32, #tpu.memory_space<vmem>>, %arg1: memref<8x32xf32, #tpu.memory_space<vmem>>, %arg2: memref<32x32xf32, #tpu.memory_space<vmem>>, %arg3: memref<32x32xf32, #tpu.memory_space<vmem>>, %arg4: memref<1x32xf32, #tpu.memory_space<vmem>>, %arg5: memref<8x32xf32, #tpu.memory_space<vmem>>) attributes {dimension_semantics = [], scalar_prefetch = 0 : i64, scratch_operands = 0 : i64, tpu.core_type = #tpu.core_type<tc>} {
    %c0 = arith.constant 0 : index
    %c0_0 = arith.constant 0 : index
    %0 = vector.load %arg0[%c0, %c0_0] : memref<8x32xf32, #tpu.memory_space<vmem>>, vector<8x32xf32>
    %c0_1 = arith.constant 0 : index
    %c0_2 = arith.constant 0 : index
    %1 = vector.load %arg2[%c0_1, %c0_2] : memref<32x32xf32, #tpu.memory_space<vmem>>, vector<32x32xf32>
    %cst = arith.constant dense<0.000000e+00> : vector<8x32xf32>
    %2 = tpu.matmul %0, %1, %cst {dimension_numbers = #tpu.dot_dimension_numbers<[1], [0], [0], [1], [0, 0, 1, 1], [], []>} : vector<8x32xf32>, vector<32x32xf32>, vector<8x32xf32> -> vector<8x32xf32>
    %c0_3 = arith.constant 0 : index
    %c0_4 = arith.constant 0 : index
    %3 = vector.load %arg1[%c0_3, %c0_4] : memref<8x32xf32, #tpu.memory_space<vmem>>, vector<8x32xf32>
    %c0_5 = arith.constant 0 : index
    %c0_6 = arith.constant 0 : index
    %4 = vector.load %arg3[%c0_5, %c0_6] : memref<32x32xf32, #tpu.memory_space<vmem>>, vector<32x32xf32>
    %cst_7 = arith.constant dense<0.000000e+00> : vector<8x32xf32>
    %5 = tpu.matmul %3, %4, %cst_7 {dimension_numbers = #tpu.dot_dimension_numbers<[1], [0], [0], [1], [0, 0, 1, 1], [], []>} : vector<8x32xf32>, vector<32x32xf32>, vector<8x32xf32> -> vector<8x32xf32>
    %6 = arith.addf %2, %5 : vector<8x32xf32>
    %c0_8 = arith.constant 0 : index
    %c0_9 = arith.constant 0 : index
    %7 = vector.load %arg4[%c0_8, %c0_9] : memref<1x32xf32, #tpu.memory_space<vmem>>, vector<1x32xf32>
    %8 = vector.broadcast %7 : vector<1x32xf32> to vector<8x32xf32>
    %9 = arith.addf %6, %8 : vector<8x32xf32>
    %cst_10 = arith.constant 0.000000e+00 : f32
    %10 = vector.broadcast %cst_10 : f32 to vector<8x32xf32>
    %11 = arith.maximumf %9, %10 : vector<8x32xf32>
    %c0_11 = arith.constant 0 : index
    %c0_12 = arith.constant 0 : index
    %12 = vector.load %arg5[%c0_11, %c0_12] : memref<8x32xf32, #tpu.memory_space<vmem>>, vector<8x32xf32>
    tpu.vector_store %arg5[%c0_11, %c0_12], %11 {strides = array<i32>} : memref<8x32xf32, #tpu.memory_space<vmem>>, vector<8x32xf32>,
    return
  }
}

</mosaic_0001>

<bundles_post_ra>
// kernel: tpu_custom_call.1
= control target key start
LH: loop header
LB: loop body
LE: loop exit
PB: predicated region body
PF: predicated region fallthrough
CT: control target
= control target key end

     0   :  { %10 = vsyncpa [#allocation3], 0  ;;  %s537_s0 = inlined_call_operand.hbm [shape: f32[8,32], index: 0, kind: input, shape index: {}]   ;;  %s538_s1 = inlined_call_operand.hbm [shape: f32[8,32], index: 1, kind: input, shape index: {}]   ;;  %s539_s2 = inlined_call_operand.hbm [shape: f32[32,32], index: 2, kind: input, shape index: {}]   ;;  %s540_s3 = inlined_call_operand.hbm [shape: f32[32,32], index: 3, kind: input, shape index: {}]   ;;  %s541_s4 = inlined_call_operand.vmem [shape: f32[1,32], index: 4, kind: input, shape index: {}]   ;;  %s542_s5 = inlined_call_operand.hbm [shape: f32[8,32], index: 5, kind: output, shape index: {}]  }
   0x1   :  { %11 = vsyncpa [#allocation6], 0 }
   0x2   :  { %12 = vsyncpa [#allocation9], 0 }
   0x3   :  { %13 = vsyncpa [#allocation4], 0  ;;  %s431_s18 = smov [#allocation5]   ;;  %s432_s20 = smov [#allocation2]  }
   0x4   :  { %s30_s19 = sshll.u32 %s431_s18, 4  ;;  %s20_s21 = sshll.u32 %s432_s20, 4  ;;  %s31_s19 = int_to_ptr.vmem [resolvable:$true] %s30_s19  ;;  %s21_s21 = int_to_ptr.vmem [resolvable:$true] %s20_s21 }
   0x5   :  { %s313_s24 = scalar_lea.hbm %s538_s1, 128 }
   0x6   :  { %p314_p0 = scmp.ne.s32.totalorder %s538_s1, %s313_s24  ;;  %p317_p1 = scmp.lt.u32.totalorder %s313_s24, %s538_s1 }
   0x8   :  { %p319_p2 = pnand %p317_p1, %p314_p0 }
   0xa   :  { %322 = shalt.err (!%p319_p2)
}
   0xb   :  { %s323_s29 = scalar_lea.vmem %s31_s19, 128  ;;  %p328_p4 = scmp.lt.s32.totalorder %s31_s19, %s31_s19 }
   0xc   :  { %p324_p3 = scmp.ne.s32.totalorder %s31_s19, %s323_s29  ;;  %p329_p5 = scmp.lt.s32.totalorder %s323_s29, %s323_s29 }
   0xe   :  { %p330_p6 = por %p329_p5, %p328_p4 }
  0x10   :  { %p331_p7 = pnand %p330_p6, %p324_p3 }
  0x12   :  { %334 = shalt.err (!%p331_p7)
}
  0x13   :  { %33 = dma.hbm_to_vmem [thread:$0]  %s538_s1, 128, %s31_s19, [#allocation6]  }
  0x14   :  { %s335_s9 = scalar_lea.hbm %s537_s0, 128 }
  0x15   :  { %p336_p8 = scmp.ne.s32.totalorder %s537_s0, %s335_s9  ;;  %p339_p9 = scmp.lt.u32.totalorder %s335_s9, %s537_s0 }
  0x17   :  { %p341_p10 = pnand %p339_p9, %p336_p8 }
  0x19   :  { %344 = shalt.err (!%p341_p10)
}
  0x1a   :  { %s345_s14 = scalar_lea.vmem %s21_s21, 128  ;;  %p350_p12 = scmp.lt.s32.totalorder %s21_s21, %s21_s21 }
  0x1b   :  { %p346_p11 = scmp.ne.s32.totalorder %s21_s21, %s345_s14  ;;  %p351_p13 = scmp.lt.s32.totalorder %s345_s14, %s345_s14 }
  0x1d   :  { %p352_p0 = por %p351_p13, %p350_p12 }
  0x1f   :  { %p353_p1 = pnand %p352_p0, %p346_p11 }
  0x21   :  { %356 = shalt.err (!%p353_p1)
}
  0x22   :  { %23 = dma.hbm_to_vmem [thread:$0]  %s537_s0, 128, %s21_s21, [#allocation3]  }
  0x23   :  { %s433_s16 = smov [#allocation7]   ;;  %s357_s20 = scalar_lea.hbm %s539_s2, 512 }
  0x24   :  { %s39_s17 = sshll.u32 %s433_s16, 4  ;;  %p358_p2 = scmp.ne.s32.totalorder %s539_s2, %s357_s20  ;;  %s40_s17 = int_to_ptr.vmem [resolvable:$true] %s39_s17 }
  0x25   :  { %p361_p3 = scmp.lt.u32.totalorder %s357_s20, %s539_s2 }
  0x27   :  { %p363_p4 = pnand %p361_p3, %p358_p2 }
  0x29   :  { %366 = shalt.err (!%p363_p4)
}
  0x2a   :  { %s367_s26 = scalar_lea.vmem %s40_s17, 512  ;;  %p372_p6 = scmp.lt.s32.totalorder %s40_s17, %s40_s17 }
  0x2b   :  { %p368_p5 = scmp.ne.s32.totalorder %s40_s17, %s367_s26  ;;  %p373_p7 = scmp.lt.s32.totalorder %s367_s26, %s367_s26 }
  0x2d   :  { %p374_p8 = por %p373_p7, %p372_p6 }
  0x2f   :  { %p375_p9 = pnand %p374_p8, %p368_p5 }
  0x31   :  { %378 = shalt.err (!%p375_p9)
}
  0x32   :  { %s434_s0 = smov 128   ;;  %s435_s21 = smov 8  }
  0x33   :  { %45 = dma.hbm_to_vmem [thread:$0]  %s539_s2, 512, %s40_s17, [#allocation6], %s434_s0, %s434_s0, %s435_s21  }
  0x34   :  { %s436_s29 = smov [#allocation8]   ;;  %s379_s8 = scalar_lea.hbm %s540_s3, 512 }
  0x35   :  { %s51_s30 = sshll.u32 %s436_s29, 4  ;;  %p380_p10 = scmp.ne.s32.totalorder %s540_s3, %s379_s8  ;;  %s52_s30 = int_to_ptr.vmem [resolvable:$true] %s51_s30 }
  0x36   :  { %p383_p11 = scmp.lt.u32.totalorder %s379_s8, %s540_s3 }
  0x38   :  { %p385_p12 = pnand %p383_p11, %p380_p10 }
  0x3a   :  { %388 = shalt.err (!%p385_p12)
}
  0x3b   :  { %s389_s13 = scalar_lea.vmem %s52_s30, 512  ;;  %p394_p0 = scmp.lt.s32.totalorder %s52_s30, %s52_s30 }
  0x3c   :  { %p390_p13 = scmp.ne.s32.totalorder %s52_s30, %s389_s13  ;;  %p395_p1 = scmp.lt.s32.totalorder %s389_s13, %s389_s13 }
  0x3e   :  { %p396_p2 = por %p395_p1, %p394_p0 }
  0x40   :  { %p397_p3 = pnand %p396_p2, %p390_p13 }
  0x42   :  { %400 = shalt.err (!%p397_p3)
}
  0x43   :  { %57 = dma.hbm_to_vmem [thread:$0]  %s540_s3, 512, %s52_s30, [#allocation9], %s434_s0, %s434_s0, %s435_s21  }
  0x44   :  { %423 = dma.done.wait [#allocation3], 128  }
  0x45   :  { %424 = vsyncadd [#allocation3], 4294967168 }
  0x46   :  { %425 = dma.done.wait [#allocation6], 640  }
  0x47   :  { %426 = vsyncadd [#allocation6], 4294966656 }
  0x48   :  { %427 = dma.done.wait [#allocation9], 512  }
  0x49   :  { %428 = vsyncadd [#allocation9], 4294966784  ;;  %v437_v0 = vmov 0.0|0.0   ;;  %vm438_vm0 = vmmov 0   ;;  %v439_v1 = vmov 0.0   ;;  %v78_v2 = vld [vmem:[#allocation8] sm:$0xff] }
  0x4a   :  { %291 = vmatprep.subr.bf16.mxu0 %v437_v0  ;;  %297 = vmatprep.subr.bf16.mxu1 %v437_v0  ;;  %v79_v3 = vld [vmem:[#allocation8 + $0x8] sm:$0xff]  ;;  %v73_v4 = vld [vmem:[#allocation7] sm:$0xff]  ;;  %v80_v7 = vld [vmem:[#allocation8 + $0x10] sm:$0xff]  ;;  %vm82_vm1 = vcmask 261120   ;;  %s440_s15 = smov [#allocation10]  }
  0x4b   :  { %277 = vmatprep.mubr.msk.f32.mxu0 %vm438_vm0, %v439_v1  ;;  %288 = vmatprep.mubr.msk.f32.mxu1 %vm438_vm0, %v439_v1  ;;  %v292_v5 = vpack.c.bf16 %v79_v3, %v78_v2  ;;  %v74_v6 = vld [vmem:[#allocation7 + $0x8] sm:$0xff]  ;;  %v81_v8 = vld [vmem:[#allocation8 + $0x18] sm:$0xff]  ;;  %v75_v10 = vld [vmem:[#allocation7 + $0x10] sm:$0xff]  ;;  %s245_s16 = sshll.u32 %s440_s15, 4  ;;  %s246_s16 = int_to_ptr.vmem [resolvable:$true] %s245_s16 }
  0x4c   :  { %v298_v9 = vpack.c.bf16 %v74_v6, %v73_v4  ;;  %v76_v11 = vld [vmem:[#allocation7 + $0x18] sm:$0xff]  ;;  %v295_v12 = vpack.c.bf16 %v81_v8, %v80_v7  ;;  %v72_v15 = vld [vmem:[#allocation2] sm:$0xff]  ;;  %s401_s17 = scalar_lea.vmem %s246_s16, 128  ;;  %p406_p5 = scmp.lt.s32.totalorder %s246_s16, %s246_s16 }
  0x4d   :  { %293 = vmatpush3.bf16.msra.mxu0 %v292_v5  ;;  %v301_v13 = vpack.c.bf16 %v76_v11, %v75_v10  ;;  %v77_v14 = vld [vmem:[#allocation5] sm:$0xff]  ;;  %v258_v18 = vld [vmem:[%s541_s4] ss:$0 sm:$0xff]  ;;  %p402_p4 = scmp.ne.s32.totalorder %s246_s16, %s401_s17  ;;  %p407_p6 = scmp.lt.s32.totalorder %s401_s17, %s401_s17 }
  0x4e   :  { %299 = vmatpush3.bf16.msra.mxu1 %v298_v9  ;;  %294 = vmatprep.subr.bf16.mxu0 %v437_v0 }
  0x4f   :  { %300 = vmatprep.subr.bf16.mxu1 %v437_v0  ;;  %p408_p7 = por %p407_p6, %p406_p5 }
  0x51   :  { %296 = vmatpush3.bf16.msra.mxu0 %v295_v12  ;;  %p409_p8 = pnand %p408_p7, %p402_p4 }
  0x52   :  { %302 = vmatpush3.bf16.msra.mxu1 %v301_v13 }
  0x54   :  { %278 = vmatmul.mubr.msk.f32.vlgmr.msra.gmra.mrb[0].mxu0 %vm82_vm1, %v77_v14 }
  0x55   :  { %289 = vmatmul.mubr.msk.f32.vlgmr.msra.gmra.mrb[0].mxu1 %vm82_vm1, %v72_v15 }
 0x127   :  { %v152_v16 = vpop.f32.mrb[0].mxu0 }
 0x128   :  { %v225_v17 = vpop.f32.mrb[0].mxu1  ;;  %v279_v19 = vpop.f32.mrb[1].mxu0 }
 0x129   :  { %v226_v20 = vadd.f32 %v225_v17, %v152_v16  ;;  %v290_v21 = vpop.f32.mrb[1].mxu1 }
 0x12b   :  { %v236_v22 = vadd.f32 %v258_v18, %v226_v20 }
 0x12d   :  { %v237_v23 = vmax.f32 %v236_v22, 0.0 }
 0x12f   :  { %238 = vst.msk [vmem:[#allocation10] sm:$0xff] %vm82_vm1, %v237_v23 }
 0x130   :  { %412 = shalt.err (!%p409_p8)
}
 0x131   :  { %s413_s4 = scalar_lea.hbm %s542_s5, 128 }
 0x132   :  { %p414_p9 = scmp.ne.s32.totalorder %s542_s5, %s413_s4  ;;  %p417_p10 = scmp.lt.u32.totalorder %s413_s4, %s542_s5 }
 0x134   :  { %p419_p11 = pnand %p417_p10, %p414_p9 }
 0x136   :  { %422 = shalt.err (!%p419_p11)
}
 0x137   :  { %248 = dma.vmem_to_hbm [thread:$0]  %s246_s16, 128, %s542_s5, [#allocation4]  }
 0x138   :  { %429 = dma.done.wait [#allocation4], 128  }
 0x139   :  { %430 = vsyncadd [#allocation4], 4294967168 }
 0x13a   :  { %252 = vsyncpa [#allocation3], 1 }
 0x13b   :  { %253 = vsyncpa [#allocation6], 1 }
 0x13c   :  { %254 = vsyncpa [#allocation9], 1 }
 0x13d   :  { %255 = vsyncpa [#allocation4], 1 }

</bundles_post_ra>
